<compile_context>
chip_gen: v7x
topology: tpu7x:2x2x1
jax: 0.10.0
libtpu: 0.0.40
codegen_flags: <defaults>
</compile_context>

<pallas_src>
import functools

import jax
import jax.numpy as jnp
from jax.experimental import pallas as pl
from jax.experimental.pallas import tpu as pltpu


def _round_up(x, m):
    return ((x + m - 1) // m) * m


def _bce_partial_sum_kernel(x_ref, z_ref, o_ref, *, TM, L, steps, tiles,
                            full_rows, rem, needs_mask):
    """Stable BCE-with-logits partial sums.

    loss(x, z) = max(x, 0) - x*z + log(1 + exp(-|x|))   (PyTorch's stable form)

    o_ref is an (8, L) f32 partial-sum block, resident across the serial
    reduction axis `j`; one such block per parallel grid index `p`.
    """
    p = pl.program_id(0)
    j = pl.program_id(1)

    @pl.when(j == 0)
    def _():
        o_ref[...] = jnp.zeros_like(o_ref)

    # Cast in-kernel (VPU) -- inputs stay in their native dtype in HBM.
    x = x_ref[...].astype(jnp.float32)
    z = z_ref[...].astype(jnp.float32)
    loss = jnp.maximum(x, 0.0) - x * z + jnp.log1p(jnp.exp(-jnp.abs(x)))

    def _accum(vals):
        # Sublane-group accumulation: (TM, L) -> (8, L) pure VPU adds,
        # no cross-lane (XLU) traffic.
        o_ref[...] += vals.reshape(TM // 8, 8, L).sum(axis=0)

    if needs_mask:
        t = p * steps + j                 # global tile index
        is_tail = t == (tiles - 1)        # only the last tile holds padding

        @pl.when(jnp.logical_not(is_tail))
        def _():
            _accum(loss)

        @pl.when(is_tail)
        def _():
            # Everything at/after flat element full_rows*L + rem is padding or
            # garbage from the clipped (partial) DMA and must not contribute.
            g_row0 = t * TM
            rows_i = jax.lax.broadcasted_iota(jnp.int32, (TM, L), 0) + g_row0
            cols_i = jax.lax.broadcasted_iota(jnp.int32, (TM, L), 1)
            valid = (rows_i < full_rows) | ((rows_i == full_rows) & (cols_i < rem))
            _accum(jnp.where(valid, loss, 0.0))
    else:
        _accum(loss)


_LANE_CANDIDATES = (2048, 1024, 512, 256, 128)
_BLOCK_ELEMS = 512 * 1024      # ~2 MiB f32 per input block (x2 double buffers)


def squeeze_bce_loss(logits, target):
    """logits: (N, 1, H, W); target: (N, H, W) any numeric/bool dtype.

    Equivalent to: BCEWithLogitsLoss()(logits, target.unsqueeze(1).float())
    """
    assert logits.shape == (target.shape[0], 1) + tuple(target.shape[1:]), (
        logits.shape, target.shape)

    T = int(logits.size)                  # number of valid elements

    # Largest lane-dense width that divides T -> no wrapper-side pad copy.
    L = next((c for c in _LANE_CANDIDATES if T % c == 0), 512)

    rows = -(-T // L)                     # logical rows of the (rows, L) slab
    TM_cap = max(8, (_BLOCK_ELEMS // L) // 8 * 8)
    TM = min(TM_cap, _round_up(rows, 8))  # row tile, multiple of 8
    tiles = -(-rows // TM)

    # Prefer an even tile count so both v7x TensorCores get a partial-sum group.
    if tiles > 1 and tiles % 2 == 1:
        TM_alt = _round_up(-(-rows // (tiles + 1)), 8)
        if TM_alt >= 8 and (-(-rows // TM_alt)) % 2 == 0:
            TM = TM_alt
            tiles = -(-rows // TM)
    P = 2 if (tiles >= 2 and tiles % 2 == 0) else 1
    steps = tiles // P                    # serial reduction steps per group

    x_flat = logits.reshape(-1)
    z_flat = target.reshape(-1)
    if z_flat.dtype == jnp.bool_:
        z_flat = z_flat.astype(jnp.int8)  # Pallas-friendly narrow dtype
    if T % L != 0:
        # Minimal tail pad (< L elements) only when L does not divide T.
        pad = rows * L - T
        x_flat = jnp.pad(x_flat, (0, pad))
        z_flat = jnp.pad(z_flat, (0, pad))
    x2d = x_flat.reshape(rows, L)
    z2d = z_flat.reshape(rows, L)

    needs_mask = (tiles * TM * L) != T    # any pad rows / pad lanes / OOB rows

    kernel = functools.partial(
        _bce_partial_sum_kernel,
        TM=TM, L=L, steps=steps, tiles=tiles,
        full_rows=T // L, rem=T % L, needs_mask=needs_mask,
    )

    partials = pl.pallas_call(
        kernel,
        out_shape=jax.ShapeDtypeStruct((P * 8, L), jnp.float32),
        grid_spec=pltpu.PrefetchScalarGridSpec(
            num_scalar_prefetch=0,
            grid=(P, steps),
            in_specs=[
                pl.BlockSpec((TM, L), lambda p, j: (p * steps + j, 0)),
                pl.BlockSpec((TM, L), lambda p, j: (p * steps + j, 0)),
            ],
            out_specs=pl.BlockSpec((8, L), lambda p, j: (p, 0)),
        ),
        compiler_params=pltpu.CompilerParams(
            # p: independent partial sums (megacore-shardable on v7x),
            # j: serial reduction axis.
            dimension_semantics=("parallel", "arbitrary"),
            vmem_limit_bytes=32 * 1024 * 1024,
        ),
    )(x2d, z2d)

    # Tiny final reduce over (P*8, L) partials + mean.
    return (jnp.sum(partials) / jnp.float32(T)).astype(jnp.float32)


def _reference(logits, target):
    target = target[:, None, :, :].astype(jnp.float32)
    x = logits.astype(jnp.float32)
    loss = jnp.maximum(x, 0.0) - x * target + jnp.log1p(jnp.exp(-jnp.abs(x)))
    return jnp.mean(loss)


if __name__ == "__main__":
    key = jax.random.PRNGKey(0)
    k1, k2 = jax.random.split(key)

    N, C, H, W = 2, 1, 16, 16
    logits = jax.random.normal(k1, (N, C, H, W), dtype=jnp.float32)
    # binary target mask, shape (N, H, W) like a segmentation label
    target = (jax.random.uniform(k2, (N, H, W)) > 0.5).astype(jnp.int32)

    loss = squeeze_bce_loss(logits, target)
    jax.block_until_ready(loss)

    ref = _reference(logits, target)
    assert jnp.allclose(loss, ref, atol=1e-5, rtol=1e-5), (loss, ref)

    print("KERNEL_OK")
</pallas_src>

<mosaic_0001>
module attributes {stable_mosaic.version = 11 : i64} {
  func.func @_bce_partial_sum_kernel(%arg0: i32, %arg1: i32, %arg2: memref<8x512xf32, #tpu.memory_space<vmem>>, %arg3: memref<8x512xi32, #tpu.memory_space<vmem>>, %arg4: memref<8x512xf32, #tpu.memory_space<vmem>>) attributes {dimension_semantics = [#tpu.dimension_semantics<parallel>, #tpu.dimension_semantics<arbitrary>], iteration_bounds = array<i64: 1, 1>, scalar_prefetch = 0 : i64, scratch_operands = 0 : i64, tpu.core_type = #tpu.core_type<tc>, window_params = [{transform_indices = @transform_0, window_bounds = array<i64: 8, 512>}, {transform_indices = @transform_1, window_bounds = array<i64: 8, 512>}, {transform_indices = @transform_2, window_bounds = array<i64: 8, 512>}]} {
    %c0_i32 = arith.constant 0 : i32
    %0 = arith.cmpi eq, %arg1, %c0_i32 : i32
    %1 = arith.extui %0 : i1 to i32
    %c0_i32_0 = arith.constant 0 : i32
    %2 = arith.cmpi ne, %1, %c0_i32_0 : i32
    scf.if %2 {
      %cst_8 = arith.constant 0.000000e+00 : f32
      %24 = vector.broadcast %cst_8 : f32 to vector<8x512xf32>
      %c0_9 = arith.constant 0 : index
      %c0_10 = arith.constant 0 : index
      %25 = vector.load %arg4[%c0_9, %c0_10] : memref<8x512xf32, #tpu.memory_space<vmem>>, vector<8x512xf32>
      tpu.vector_store %arg4[%c0_9, %c0_10], %24 {strides = array<i32>} : memref<8x512xf32, #tpu.memory_space<vmem>>, vector<8x512xf32>,
    } else {
    }
    %c0 = arith.constant 0 : index
    %c0_1 = arith.constant 0 : index
    %3 = vector.load %arg2[%c0, %c0_1] : memref<8x512xf32, #tpu.memory_space<vmem>>, vector<8x512xf32>
    %c0_2 = arith.constant 0 : index
    %c0_3 = arith.constant 0 : index
    %4 = vector.load %arg3[%c0_2, %c0_3] : memref<8x512xi32, #tpu.memory_space<vmem>>, vector<8x512xi32>
    %5 = arith.sitofp %4 : vector<8x512xi32> to vector<8x512xf32>
    %cst = arith.constant 0.000000e+00 : f32
    %6 = vector.broadcast %cst : f32 to vector<8x512xf32>
    %7 = arith.maximumf %3, %6 : vector<8x512xf32>
    %8 = arith.mulf %3, %5 : vector<8x512xf32>
    %9 = arith.subf %7, %8 : vector<8x512xf32>
    %10 = math.absf %3 : vector<8x512xf32>
    %cst_4 = arith.constant 0.000000e+00 : f32
    %11 = vector.broadcast %cst_4 : f32 to vector<8x512xf32>
    %12 = arith.subf %11, %10 : vector<8x512xf32>
    %13 = math.exp %12 : vector<8x512xf32>
    %14 = math.log1p %13 : vector<8x512xf32>
    %15 = arith.addf %9, %14 : vector<8x512xf32>
    %c1_i32 = arith.constant 1 : i32
    %16 = arith.muli %arg0, %c1_i32 : i32
    %17 = arith.addi %16, %arg1 : i32
    %c0_i32_5 = arith.constant 0 : i32
    %18 = arith.cmpi eq, %17, %c0_i32_5 : i32
    %true = arith.constant true
    %19 = arith.xori %18, %true : i1
    %20 = arith.extui %19 : i1 to i32
    %c0_i32_6 = arith.constant 0 : i32
    %21 = arith.cmpi ne, %20, %c0_i32_6 : i32
    scf.if %21 {
      %c0_8 = arith.constant 0 : index
      %c0_9 = arith.constant 0 : index
      %24 = vector.load %arg4[%c0_8, %c0_9] : memref<8x512xf32, #tpu.memory_space<vmem>>, vector<8x512xf32>
      %25 = vector.shape_cast %15 : vector<8x512xf32> to vector<1x8x512xf32>
      %cst_10 = arith.constant dense<0.000000e+00> : vector<8x512xf32>
      %26 = vector.multi_reduction <add>, %25, %cst_10 [0] : vector<1x8x512xf32> to vector<8x512xf32>
      %27 = arith.addf %24, %26 : vector<8x512xf32>
      %c0_11 = arith.constant 0 : index
      %c0_12 = arith.constant 0 : index
      %28 = vector.load %arg4[%c0_11, %c0_12] : memref<8x512xf32, #tpu.memory_space<vmem>>, vector<8x512xf32>
      tpu.vector_store %arg4[%c0_11, %c0_12], %27 {strides = array<i32>} : memref<8x512xf32, #tpu.memory_space<vmem>>, vector<8x512xf32>,
    } else {
    }
    %22 = arith.extui %18 : i1 to i32
    %c0_i32_7 = arith.constant 0 : i32
    %23 = arith.cmpi ne, %22, %c0_i32_7 : i32
    scf.if %23 {
      %c8_i32 = arith.constant 8 : i32
      %24 = arith.muli %17, %c8_i32 : i32
      %25 = tpu.iota {dimensions = array<i32: 0>} : vector<8x512xi32>
      %26 = vector.broadcast %24 : i32 to vector<8x512xi32>
      %27 = arith.addi %25, %26 : vector<8x512xi32>
      %28 = tpu.iota {dimensions = array<i32: 1>} : vector<8x512xi32>
      %c1_i32_8 = arith.constant 1 : i32
      %29 = vector.broadcast %c1_i32_8 : i32 to vector<8x512xi32>
      %30 = arith.cmpi slt, %27, %29 : vector<8x512xi32>
      %c1_i32_9 = arith.constant 1 : i32
      %31 = vector.broadcast %c1_i32_9 : i32 to vector<8x512xi32>
      %32 = arith.cmpi eq, %27, %31 : vector<8x512xi32>
      %c0_i32_10 = arith.constant 0 : i32
      %33 = vector.broadcast %c0_i32_10 : i32 to vector<8x512xi32>
      %34 = arith.cmpi slt, %28, %33 : vector<8x512xi32>
      %35 = arith.andi %32, %34 : vector<8x512xi1>
      %36 = arith.ori %30, %35 : vector<8x512xi1>
      %cst_11 = arith.constant 0.000000e+00 : f32
      %37 = vector.broadcast %cst_11 : f32 to vector<8x512xf32>
      %38 = arith.select %36, %15, %37 : vector<8x512xi1>, vector<8x512xf32>
      %c0_12 = arith.constant 0 : index
      %c0_13 = arith.constant 0 : index
      %39 = vector.load %arg4[%c0_12, %c0_13] : memref<8x512xf32, #tpu.memory_space<vmem>>, vector<8x512xf32>
      %40 = vector.shape_cast %38 : vector<8x512xf32> to vector<1x8x512xf32>
      %cst_14 = arith.constant dense<0.000000e+00> : vector<8x512xf32>
      %41 = vector.multi_reduction <add>, %40, %cst_14 [0] : vector<1x8x512xf32> to vector<8x512xf32>
      %42 = arith.addf %39, %41 : vector<8x512xf32>
      %c0_15 = arith.constant 0 : index
      %c0_16 = arith.constant 0 : index
      %43 = vector.load %arg4[%c0_15, %c0_16] : memref<8x512xf32, #tpu.memory_space<vmem>>, vector<8x512xf32>
      tpu.vector_store %arg4[%c0_15, %c0_16], %42 {strides = array<i32>} : memref<8x512xf32, #tpu.memory_space<vmem>>, vector<8x512xf32>,
    } else {
    }
    return
  }
  func.func @transform_0(%arg0: i32, %arg1: i32) -> (i32, i32) {
    %c1_i32 = arith.constant 1 : i32
    %0 = arith.muli %arg0, %c1_i32 : i32
    %1 = arith.addi %0, %arg1 : i32
    %c0_i32 = arith.constant 0 : i32
    %c0_i32_0 = arith.constant 0 : i32
    return %1, %c0_i32 : i32, i32
  }
  func.func @transform_1(%arg0: i32, %arg1: i32) -> (i32, i32) {
    %c1_i32 = arith.constant 1 : i32
    %0 = arith.muli %arg0, %c1_i32 : i32
    %1 = arith.addi %0, %arg1 : i32
    %c0_i32 = arith.constant 0 : i32
    %c0_i32_0 = arith.constant 0 : i32
    return %1, %c0_i32 : i32, i32
  }
  func.func @transform_2(%arg0: i32, %arg1: i32) -> (i32, i32) {
    %c0_i32 = arith.constant 0 : i32
    %c0_i32_0 = arith.constant 0 : i32
    return %arg0, %c0_i32 : i32, i32
  }
}

</mosaic_0001>

<bundles_post_ra>
// kernel: tpu_custom_call.1
= control target key start
LH: loop header
LB: loop body
LE: loop exit
PB: predicated region body
PF: predicated region fallthrough
CT: control target
= control target key end

     0   :  { %7 = vsyncpa [#allocation3], 0  ;;  %s784_s0 = inlined_call_operand.hbm [shape: f32[1,512], index: 0, kind: input, shape index: {}]   ;;  %s785_s1 = inlined_call_operand.hbm [shape: s32[1,512], index: 1, kind: input, shape index: {}]   ;;  %s786_s2 = inlined_call_operand.hbm [shape: f32[8,512], index: 2, kind: output, shape index: {}]  }
   0x1   :  { %8 = vsyncpa [#allocation6], 0 }
   0x2   :  { %9 = vsyncpa [#allocation4], 0 }
   0x3   :  { %19 = vsyncadd [#allocation3], 448  ;;  %s598_s9 = smov [#allocation2]   ;;  %s526_s13 = scalar_lea.hbm %s784_s0, 64 }
   0x4   :  { %s25_s10 = sshll.u32 %s598_s9, 4  ;;  %p527_p0 = scmp.ne.s32.totalorder %s784_s0, %s526_s13  ;;  %s26_s10 = int_to_ptr.vmem [resolvable:$true] %s25_s10 }
   0x5   :  { %p530_p1 = scmp.lt.u32.totalorder %s526_s13, %s784_s0 }
   0x7   :  { %p532_p2 = pnand %p530_p1, %p527_p0 }
   0x9   :  { %535 = shalt.err (!%p532_p2)
}
   0xa   :  { %s536_s18 = scalar_lea.vmem %s26_s10, 64  ;;  %s540_s19 = scalar_lea.vmem %s26_s10, 512 }
   0xb   :  { %p537_p3 = scmp.ne.s32.totalorder %s26_s10, %s536_s18  ;;  %p541_p4 = scmp.lt.s32.totalorder %s26_s10, %s26_s10 }
   0xc   :  { %p542_p5 = scmp.lt.s32.totalorder %s540_s19, %s536_s18 }
   0xe   :  { %p543_p6 = por %p542_p5, %p541_p4 }
  0x10   :  { %p544_p7 = pnand %p543_p6, %p537_p3 }
  0x12   :  { %547 = shalt.err (!%p544_p7)
}
  0x13   :  { %s599_s20 = smov 64   ;;  %s600_s21 = smov 4  }
  0x14   :  { %31 = dma.hbm_to_vmem [thread:$0]  %s784_s0, 64, %s26_s10, [#allocation3], %s599_s20, %s599_s20, %s600_s21  }
  0x15   :  { %41 = vsyncadd [#allocation6], 448  ;;  %s601_s24 = smov [#allocation5]   ;;  %s548_s28 = scalar_lea.hbm %s785_s1, 64 }
  0x16   :  { %s47_s25 = sshll.u32 %s601_s24, 4  ;;  %p549_p8 = scmp.ne.s32.totalorder %s785_s1, %s548_s28  ;;  %s48_s25 = int_to_ptr.vmem [resolvable:$true] %s47_s25 }
  0x17   :  { %p552_p9 = scmp.lt.u32.totalorder %s548_s28, %s785_s1 }
  0x19   :  { %p554_p10 = pnand %p552_p9, %p549_p8 }
  0x1b   :  { %557 = shalt.err (!%p554_p10)
}
  0x1c   :  { %s558_s5 = scalar_lea.vmem %s48_s25, 64  ;;  %s562_s0 = scalar_lea.vmem %s48_s25, 512 }
  0x1d   :  { %p559_p11 = scmp.ne.s32.totalorder %s48_s25, %s558_s5  ;;  %p563_p12 = scmp.lt.s32.totalorder %s48_s25, %s48_s25 }
  0x1e   :  { %p564_p13 = scmp.lt.s32.totalorder %s562_s0, %s558_s5 }
  0x20   :  { %p565_p0 = por %p564_p13, %p563_p12 }
  0x22   :  { %p566_p1 = pnand %p565_p0, %p559_p11 }
  0x24   :  { %569 = shalt.err (!%p566_p1)
}
  0x25   :  { %53 = dma.hbm_to_vmem [thread:$0]  %s785_s1, 64, %s48_s25, [#allocation6], %s599_s20, %s599_s20, %s600_s21  }
  0x26   :  { %592 = dma.done.wait [#allocation3], 512  }
  0x27   :  { %593 = vsyncadd [#allocation3], 4294966784 }
  0x28   :  { %594 = dma.done.wait [#allocation6], 512  }
  0x29   :  { %595 = vsyncadd [#allocation6], 4294966784  ;;  %v643_v0 = vld [vmem:[#allocation2] sm:$0xf]  ;;  %v645_v1 = vld [vmem:[#allocation2 + $0x4] sm:$0xf]  ;;  %v348_v24 = vlaneseq }
  0x2a   :  { %v647_v2 = vld [vmem:[#allocation2 + $0x8] sm:$0xf]  ;;  %v649_v3 = vld [vmem:[#allocation2 + $0xc] sm:$0xf]  ;;  %v651_v4 = vld [vmem:[#allocation2 + $0x10] sm:$0xf] }
  0x2b   :  { %v653_v5 = vld [vmem:[#allocation2 + $0x14] sm:$0xf]  ;;  %v655_v6 = vld [vmem:[#allocation2 + $0x18] sm:$0xf]  ;;  %v657_v7 = vld [vmem:[#allocation2 + $0x1c] sm:$0xf] }
  0x2c   :  { %v126_v8 = vand.u32 2147483647, %v643_v0  ;;  %v127_v9 = vand.u32 2147483647, %v645_v1  ;;  %v128_v10 = vand.u32 2147483647, %v647_v2 }
  0x2d   :  { %v129_v11 = vand.u32 2147483647, %v649_v3  ;;  %v130_v12 = vand.u32 2147483647, %v651_v4  ;;  %v131_v13 = vand.u32 2147483647, %v653_v5 }
  0x2e   :  { %v132_v14 = vand.u32 2147483647, %v655_v6  ;;  %v134_v15 = vsub.f32 0.0, %v126_v8  ;;  %v135_v16 = vsub.f32 0.0, %v127_v9  ;;  %v133_v17 = vand.u32 2147483647, %v657_v7 }
  0x2f   :  { %v136_v18 = vsub.f32 0.0, %v128_v10  ;;  %v137_v19 = vsub.f32 0.0, %v129_v11  ;;  %v138_v20 = vsub.f32 0.0, %v130_v12  ;;  %v139_v21 = vsub.f32 0.0, %v131_v13  ;;  %v86_v33 = vld [vmem:[#allocation5] sm:$0xf] }
  0x30   :  { %v142_v22 = vmul.f32 1.442695, %v134_v15  ;;  %v144_v23 = vmul.f32 1.442695, %v135_v16  ;;  %v140_v25 = vsub.f32 0.0, %v132_v14  ;;  %v141_v31 = vsub.f32 0.0, %v133_v17 }
  0x31   :  { %v146_v26 = vmul.f32 1.442695, %v136_v18  ;;  %v148_v27 = vmul.f32 1.442695, %v137_v19  ;;  %v602_v28 = vmov 1966171168   ;;  %v94_v45 = vcvt.s32.f32 %v86_v33 }
  0x32   :  { %v384_v29 = vunpack.c.l.s4 %v602_v28  ;;  %494 = vpow2.f32 %v142_v22  ;;  %v150_v30 = vmul.f32 1.442695, %v138_v20  ;;  %v152_v32 = vmul.f32 1.442695, %v139_v21  ;;  %v87_v37 = vld [vmem:[#allocation5 + $0x4] sm:$0xf] }
  0x33   :  { %496 = vpow2.f32 %v144_v23  ;;  %v154_v34 = vmul.f32 1.442695, %v140_v25  ;;  %v667_v35 = vshrl.u32 %v348_v24, 7  ;;  %v88_v38 = vld [vmem:[#allocation5 + $0x8] sm:$0xf]  ;;  %v95_v46 = vcvt.s32.f32 %v87_v37  ;;  %s603_s1 = smov [#allocation7]  }
  0x34   :  { %498 = vpow2.f32 %v146_v26  ;;  %v385_v36 = vunpack.c.0.s8 %v384_v29  ;;  %v89_v39 = vld [vmem:[#allocation5 + $0xc] sm:$0xf]  ;;  %v90_v40 = vld [vmem:[#allocation5 + $0x10] sm:$0xf]  ;;  %v91_v41 = vld [vmem:[#allocation5 + $0x14] sm:$0xf]  ;;  %v96_v48 = vcvt.s32.f32 %v88_v38  ;;  %v110_v10 = vmul.f32 %v94_v45, %v643_v0 }
  0x35   :  { %500 = vpow2.f32 %v148_v27  ;;  %v156_v42 = vmul.f32 1.442695, %v141_v31  ;;  %v92_v43 = vld [vmem:[#allocation5 + $0x18] sm:$0xf]  ;;  %v93_v44 = vld [vmem:[#allocation5 + $0x1c] sm:$0xf]  ;;  %v97_v49 = vcvt.s32.f32 %v89_v39  ;;  %v98_v50 = vcvt.s32.f32 %v90_v40 }
  0x36   :  { %502 = vpow2.f32 %v150_v30  ;;  %v670_v47 = vsub.s32 %v385_v36, %v667_v35  ;;  %v99_v51 = vcvt.s32.f32 %v91_v41  ;;  %v100_v52 = vcvt.s32.f32 %v92_v43  ;;  %s477_s8 = sshll.u32 %s603_s1, 4  ;;  %s478_s8 = int_to_ptr.vmem [resolvable:$true] %s477_s8 }
  0x37   :  { %504 = vpow2.f32 %v152_v32  ;;  %v101_v53 = vcvt.s32.f32 %v93_v44  ;;  %v102_v54 = vmax.f32 %v643_v0, 0.0  ;;  %v103_v56 = vmax.f32 %v645_v1, 0.0  ;;  %s570_s9 = scalar_lea.vmem %s478_s8, 512  ;;  %p575_p3 = scmp.lt.s32.totalorder %s478_s8, %s478_s8 }
  0x38   :  { %506 = vpow2.f32 %v154_v34  ;;  %v104_v57 = vmax.f32 %v647_v2, 0.0  ;;  %v105_v58 = vmax.f32 %v649_v3, 0.0  ;;  %v106_v59 = vmax.f32 %v651_v4, 0.0  ;;  %p571_p2 = scmp.ne.s32.totalorder %s478_s8, %s570_s9  ;;  %p576_p4 = scmp.lt.s32.totalorder %s570_s9, %s570_s9 }
  0x39   :  { %508 = vpow2.f32 %v156_v42  ;;  %v107_v61 = vmax.f32 %v653_v5, 0.0  ;;  %v108_v62 = vmax.f32 %v655_v6, 0.0  ;;  %v109_v63 = vmax.f32 %v657_v7, 0.0 }
  0x3a   :  { %v111_v11 = vmul.f32 %v95_v46, %v645_v1  ;;  %v112_v12 = vmul.f32 %v96_v48, %v647_v2  ;;  %v113_v15 = vmul.f32 %v97_v49, %v649_v3  ;;  %v114_v16 = vmul.f32 %v98_v50, %v651_v4  ;;  %p577_p5 = por %p576_p4, %p575_p3 }
  0x3b   :  { %v688_v19 = vmul.f32 %v99_v51, %v653_v5  ;;  %v691_v1 = vmul.f32 %v100_v52, %v655_v6  ;;  %v694_v2 = vmul.f32 %v101_v53, %v657_v7  ;;  %v118_v4 = vsub.f32 %v102_v54, %v110_v10 }
  0x3c   :  { %v495_v55 = vpop.eup %494  ;;  %v119_v22 = vsub.f32 %v103_v56, %v111_v11  ;;  %v120_v29 = vsub.f32 %v104_v57, %v112_v12  ;;  %v121_v30 = vsub.f32 %v105_v58, %v113_v15  ;;  %v122_v38 = vsub.f32 %v106_v59, %v114_v16  ;;  %p578_p6 = pnand %p577_p5, %p571_p2 }
  0x3d   :  { %v497_v60 = vpop.eup %496  ;;  %v158_v8 = vadd.f32 1.0, %v495_v55  ;;  %v161_v20 = vmul.f32 -0.5, %v495_v55  ;;  %v164_v23 = vand.u32 2147483647, %v495_v55  ;;  %v124_v5 = vsub.f32 %v108_v62, %v691_v1 }
  0x3e   :  { %v499_v9 = vpop.eup %498  ;;  %v167_v13 = vadd.f32 1.0, %v497_v60  ;;  %v170_v0 = vmul.f32 -0.5, %v497_v60  ;;  %v173_v26 = vand.u32 2147483647, %v497_v60  ;;  %v125_v1 = vsub.f32 %v109_v63, %v694_v2 }
  0x3f   :  { %v501_v14 = vpop.eup %500  ;;  %510 = vlog2.f32 %v158_v8  ;;  %v176_v17 = vadd.f32 1.0, %v499_v9  ;;  %v179_v24 = vmul.f32 -0.5, %v499_v9  ;;  %v162_v31 = vadd.f32 1.0, %v161_v20 }
  0x40   :  { %v685_v18 = vpop.eup %502  ;;  %512 = vlog2.f32 %v167_v13  ;;  %v185_v3 = vadd.f32 1.0, %v501_v14  ;;  %v188_v27 = vmul.f32 -0.5, %v501_v14  ;;  %v171_v32 = vadd.f32 1.0, %v170_v0 }
  0x41   :  { %514 = vlog2.f32 %v176_v17  ;;  %v696_v21 = vpop.eup %504  ;;  %v194_v28 = vadd.f32 1.0, %v685_v18  ;;  %v182_v34 = vand.u32 2147483647, %v499_v9  ;;  %v197_v36 = vmul.f32 -0.5, %v685_v18 }
  0x42   :  { %v698_v25 = vpop.eup %506  ;;  %516 = vlog2.f32 %v185_v3  ;;  %v203_v37 = vadd.f32 1.0, %v696_v21  ;;  %v180_v39 = vadd.f32 1.0, %v179_v24  ;;  %v191_v40 = vand.u32 2147483647, %v501_v14 }
  0x43   :  { %v701_v33 = vpop.eup %508  ;;  %518 = vlog2.f32 %v194_v28  ;;  %v212_v41 = vadd.f32 1.0, %v698_v25  ;;  %vm706_vm0 = vcmp.lt.f32.partialorder %v164_v23, 0.0004427343  ;;  %vm710_vm1 = vcmp.lt.f32.partialorder %v173_v26, 0.0004427343 }
  0x44   :  { %v189_v44 = vadd.f32 1.0, %v188_v27  ;;  %520 = vlog2.f32 %v203_v37  ;;  %v163_v45 = vmul.f32 %v495_v55, %v162_v31  ;;  %v206_v46 = vmul.f32 -0.5, %v696_v21 }
  0x45   :  { %522 = vlog2.f32 %v212_v41  ;;  %v221_v48 = vadd.f32 1.0, %v701_v33  ;;  %v172_v50 = vmul.f32 %v497_v60, %v171_v32  ;;  %vm716_vm2 = vcmp.lt.f32.partialorder %v182_v34, 0.0004427343 }
  0x46   :  { %v198_v52 = vadd.f32 1.0, %v197_v36  ;;  %v215_v53 = vmul.f32 -0.5, %v698_v25  ;;  %v181_v57 = vmul.f32 %v499_v9, %v180_v39  ;;  %vm721_vm3 = vcmp.lt.f32.partialorder %v191_v40, 0.0004427343 }
  0x47   :  { %524 = vlog2.f32 %v221_v48  ;;  %v190_v8 = vmul.f32 %v501_v14, %v189_v44  ;;  %v200_v60 = vand.u32 2147483647, %v685_v18  ;;  %v224_v10 = vmul.f32 -0.5, %v701_v33 }
  0x48   :  { %v207_v13 = vadd.f32 1.0, %v206_v46  ;;  %v209_v15 = vand.u32 2147483647, %v696_v21  ;;  %v199_v17 = vmul.f32 %v685_v18, %v198_v52  ;;  %v216_v20 = vadd.f32 1.0, %v215_v53 }
  0x49   :  { %v511_v49 = vpop.eup %510  ;;  %v218_v14 = vand.u32 2147483647, %v698_v25  ;;  %v123_v27 = vsub.f32 %v107_v61, %v688_v19  ;;  %vm739_vm4 = vcmp.lt.f32.partialorder %v200_v60, 0.0004427343  ;;  %v225_v31 = vadd.f32 1.0, %v224_v10 }
  0x4a   :  { %v513_v54 = vpop.eup %512  ;;  %v160_v56 = vmul.f32 0.6931472, %v511_v49  ;;  %v208_v36 = vmul.f32 %v696_v21, %v207_v13  ;;  %vm750_vm5 = vcmp.lt.f32.partialorder %v209_v15, 0.0004427343  ;;  %v217_v19 = vmul.f32 %v698_v25, %v216_v20 }
  0x4b   :  { %v515_v55 = vpop.eup %514  ;;  %v169_v59 = vmul.f32 0.6931472, %v513_v54  ;;  %vm219_vm6 = vcmp.lt.f32.partialorder %v218_v14, 0.0004427343  ;;  %v226_v42 = vmul.f32 %v701_v33, %v225_v31  ;;  %vm357_vm8 = vcmp.lt.s32.totalorder %v667_v35, 1 }
  0x4c   :  { %v166_v11 = vsel %vm706_vm0, %v163_v45, %v160_v56  ;;  %v178_v12 = vmul.f32 0.6931472, %v515_v55  ;;  %v517_v9 = vpop.eup %516 }
  0x4d   :  { %v175_v16 = vsel %vm710_vm1, %v172_v50, %v169_v59  ;;  %v187_v3 = vmul.f32 0.6931472, %v517_v9  ;;  %v230_v23 = vadd.f32 %v166_v11, %v118_v4  ;;  %v519_v26 = vpop.eup %518  ;;  %v227_v4 = vand.u32 2147483647, %v701_v33 }
  0x4e   :  { %v184_v0 = vsel %vm716_vm2, %v181_v57, %v178_v12  ;;  %v231_v24 = vadd.f32 %v175_v16, %v119_v22  ;;  %v196_v34 = vmul.f32 0.6931472, %v519_v26  ;;  %v521_v22 = vpop.eup %520 }
  0x4f   :  { %v232_v18 = vadd.f32 %v184_v0, %v120_v29  ;;  %v193_v32 = vsel %vm721_vm3, %v190_v8, %v187_v3  ;;  %v523_v37 = vpop.eup %522  ;;  %v205_v40 = vmul.f32 0.6931472, %v521_v22  ;;  %vm228_vm7 = vcmp.lt.f32.partialorder %v227_v4, 0.0004427343 }
  0x50   :  { %v233_v29 = vadd.f32 %v193_v32, %v121_v30  ;;  %v202_v39 = vsel %vm739_vm4, %v199_v17, %v196_v34  ;;  %v379_v21 = vcombine.low %v230_v23, %v231_v24  ;;  %v214_v41 = vmul.f32 0.6931472, %v523_v37 }
  0x51   :  { %v234_v43 = vadd.f32 %v202_v39, %v122_v38  ;;  %v525_v62 = vpop.eup %524  ;;  %v211_v25 = vsel %vm750_vm5, %v208_v36, %v205_v40 }
  0x52   :  { %v380_v6 = vcombine.low %v232_v18, %v233_v29  ;;  %v220_v30 = vsel %vm219_vm6, %v217_v19, %v214_v41  ;;  %v223_v44 = vmul.f32 0.6931472, %v525_v62  ;;  %v235_v45 = vadd.f32 %v211_v25, %v123_v27 }
  0x53   :  { %v236_v46 = vadd.f32 %v220_v30, %v124_v5  ;;  %v389_v48 = vrot.slane %v379_v21, %v670_v47 }
  0x54   :  { %v396_v49 = vrot.slane %v380_v6, %v670_v47  ;;  %v229_v33 = vsel %vm228_vm7, %v226_v42, %v223_v44  ;;  %v381_v38 = vcombine.low %v234_v43, %v235_v45 }
  0x55   :  { %v237_v50 = vadd.f32 %v229_v33, %v125_v1 }
  0x56   :  { %v403_v52 = vrot.slane %v381_v38, %v670_v47  ;;  %v411_v7 = vcombine.low %v389_v48, %v396_v49  ;;  %v412_v63 = vcombine.high %v389_v48, %v396_v49 }
  0x57   :  { %v382_v51 = vcombine.low %v236_v46, %v237_v50 }
  0x58   :  { %v421_v54 = vrot.slane %v411_v7, %v670_v47  ;;  %v428_v57 = vrot.slane %v412_v63, %v670_v47 }
  0x59   :  { %v410_v2 = vrot.slane %v382_v51, %v670_v47 }
  0x5b   :  { %v413_v53 = vcombine.low %v403_v52, %v410_v2  ;;  %v414_v56 = vcombine.high %v403_v52, %v410_v2 }
  0x5d   :  { %v435_v58 = vrot.slane %v413_v53, %v670_v47  ;;  %v442_v55 = vrot.slane %v414_v56, %v670_v47 }
  0x5f   :  { %v443_v59 = vcombine.low %v421_v54, %v435_v58  ;;  %v445_v8 = vcombine.low %v428_v57, %v442_v55  ;;  %v444_v60 = vcombine.high %v421_v54, %v435_v58  ;;  %v446_v10 = vcombine.high %v428_v57, %v442_v55 }
  0x61   :  { %v451_v11 = vsel %vm357_vm8, %v443_v59, 0.0  ;;  %v452_v12 = vsel %vm357_vm8, %v445_v8, 0.0  ;;  %v453_v13 = vsel %vm357_vm8, %v444_v60, 0.0  ;;  %v454_v15 = vsel %vm357_vm8, %v446_v10, 0.0 }
  0x62   :  { %467 = vst [vmem:[#allocation7] sm:$0xff] %v451_v11  ;;  %468 = vst [vmem:[#allocation7 + $0x8] sm:$0xff] %v452_v12 }
  0x63   :  { %469 = vst [vmem:[#allocation7 + $0x10] sm:$0xff] %v453_v13  ;;  %470 = vst [vmem:[#allocation7 + $0x18] sm:$0xff] %v454_v15 }
  0x64   :  { %581 = shalt.err (!%p578_p6)
}
  0x65   :  { %s582_s12 = scalar_lea.hbm %s786_s2, 512 }
  0x66   :  { %p583_p7 = scmp.ne.s32.totalorder %s786_s2, %s582_s12  ;;  %p586_p8 = scmp.lt.u32.totalorder %s582_s12, %s786_s2 }
  0x68   :  { %p588_p9 = pnand %p586_p8, %p583_p7 }
  0x6a   :  { %591 = shalt.err (!%p588_p9)
}
  0x6b   :  { %480 = dma.vmem_to_hbm [thread:$0]  %s478_s8, 512, %s786_s2, [#allocation4]  }
  0x6c   :  { %596 = dma.done.wait [#allocation4], 512  }
  0x6d   :  { %597 = vsyncadd [#allocation4], 4294966784 }
  0x6e   :  { %484 = vsyncpa [#allocation3], 1 }
  0x6f   :  { %485 = vsyncpa [#allocation6], 1 }
  0x70   :  { %486 = vsyncpa [#allocation4], 1 }

</bundles_post_ra>
